<compile_context>
chip_gen: v7x
topology: tpu7x:2x2x1
jax: 0.10.0
libtpu: 0.0.40
codegen_flags: <defaults>
</compile_context>

<pallas_src>
import jax
import jax.numpy as jnp
from jax.experimental import pallas as pl
from jax.experimental.pallas import tpu as pltpu


def _hbm_copy_kernel(x_hbm, o_hbm, copy_sem):
    # Whole-buffer HBM->HBM DMA: no VMEM staging, no vld/vst vreg traffic,
    # no per-tile pipelining overhead.  The DMA engine alone is HBM-bound.
    cp = pltpu.make_async_copy(x_hbm, o_hbm, copy_sem)
    cp.start()
    cp.wait()


def _materialize_copy(x):
    """Produce a freshly materialized copy of x via an HBM->HBM Pallas DMA."""
    total_bytes = x.size * jnp.dtype(x.dtype).itemsize
    return pl.pallas_call(
        _hbm_copy_kernel,
        out_shape=jax.ShapeDtypeStruct(x.shape, x.dtype),
        in_specs=[pl.BlockSpec(memory_space=pl.ANY)],
        out_specs=pl.BlockSpec(memory_space=pl.ANY),
        scratch_shapes=[pltpu.SemaphoreType.DMA],
        cost_estimate=pl.CostEstimate(
            flops=0, transcendentals=0, bytes_accessed=2 * total_bytes
        ),
    )(x)


def size_tracking_squeeze(x, sizes, dim, materialize=False):
    """JAX/Pallas equivalent of SizeTrackingSqueeze.forward.

    Default path is metadata-only (review item 1).  `materialize=True` forces
    a concrete output buffer via an HBM->HBM DMA kernel (review item 2).
    """
    ndim = x.ndim
    if dim < 0:
        dim += ndim
    # `sizes` tracks the non-batch dims, so dim must be >= 1 (and in range).
    assert 1 <= dim < ndim, f"dim must satisfy 1 <= dim < x.ndim, got {dim}"
    # Mirrors `assert x.size(self.dim) == 1` in the torch module.
    assert x.shape[dim] == 1, f"axis {dim} of x must have size 1, got {x.shape}"

    # --- size tracking: drop column dim-1 (scalar metadata, no kernel) ---
    sizes_out = jnp.concatenate([sizes[:, : dim - 1], sizes[:, dim:]], axis=1)

    # --- squeeze ---
    out_x_shape = x.shape[:dim] + x.shape[dim + 1:]
    if materialize:
        # Materialized copy through the Pallas HBM->HBM DMA kernel, then a
        # zero-cost metadata reshape to the squeezed shape.
        x_out = jnp.reshape(_materialize_copy(x), out_x_shape)
    else:
        # Pure metadata: squeezing a size-1 axis preserves row-major order.
        x_out = jnp.squeeze(x, axis=dim)

    return x_out, sizes_out


if __name__ == "__main__":
    key = jax.random.PRNGKey(0)
    k0, k1 = jax.random.split(key)

    # --- Squeeze the last axis (dim = 3) ---
    dim = 3
    x = jax.random.normal(k0, (2, 4, 16, 1), dtype=jnp.float32)
    # sizes tracks the non-batch dims (C, H, W) per example -> drop column dim-1 = 2.
    sizes = jnp.tile(jnp.array([[4, 16, 1]], dtype=jnp.int32), (2, 1))

    # Default metadata-only fast path.
    x_sq, sizes_out = size_tracking_squeeze(x, sizes, dim)
    # Pallas kernel path (explicit materialized copy via HBM->HBM DMA).
    x_sq_k, sizes_out_k = size_tracking_squeeze(x, sizes, dim, materialize=True)
    jax.block_until_ready((x_sq, sizes_out, x_sq_k, sizes_out_k))

    ref_x = jnp.squeeze(x, axis=dim)
    ref_sizes = jnp.concatenate([sizes[:, : dim - 1], sizes[:, dim:]], axis=1)
    assert x_sq.shape == ref_x.shape and x_sq.dtype == ref_x.dtype
    assert bool(jnp.array_equal(x_sq, ref_x))
    assert x_sq_k.shape == ref_x.shape and x_sq_k.dtype == ref_x.dtype
    assert bool(jnp.array_equal(x_sq_k, ref_x))
    assert sizes_out.shape == ref_sizes.shape and sizes_out.dtype == ref_sizes.dtype
    assert bool(jnp.array_equal(sizes_out, ref_sizes))
    assert bool(jnp.array_equal(sizes_out_k, ref_sizes))

    # --- Middle size-1 axis (dim = 1): metadata path ---
    dim2 = 1
    x2 = jax.random.normal(k1, (2, 1, 4, 16), dtype=jnp.float32)
    sizes2 = jnp.tile(jnp.array([[1, 4, 16]], dtype=jnp.int32), (2, 1))
    x2_sq, sizes2_out = size_tracking_squeeze(x2, sizes2, dim2)
    jax.block_until_ready((x2_sq, sizes2_out))
    assert bool(jnp.array_equal(x2_sq, jnp.squeeze(x2, axis=dim2)))
    assert bool(
        jnp.array_equal(
            sizes2_out,
            jnp.concatenate([sizes2[:, : dim2 - 1], sizes2[:, dim2:]], axis=1),
        )
    )

    print("KERNEL_OK")
</pallas_src>

<mosaic_0001>
module attributes {stable_mosaic.version = 11 : i64} {
  func.func @_hbm_copy_kernel(%arg0: memref<2x4x16x1xf32, #tpu.memory_space<any>>, %arg1: memref<2x4x16x1xf32, #tpu.memory_space<any>>, %arg2: memref<!tpu.dma_semaphore, #tpu.memory_space<semaphore_mem>>) attributes {dimension_semantics = [], scalar_prefetch = 0 : i64, scratch_operands = 1 : i64, tpu.core_type = #tpu.core_type<tc>} {
    tpu.enqueue_dma source(%arg0 : memref<2x4x16x1xf32, #tpu.memory_space<any>>) target(%arg1 : memref<2x4x16x1xf32, #tpu.memory_space<any>>) target_semaphore(%arg2 : memref<!tpu.dma_semaphore, #tpu.memory_space<semaphore_mem>>)
    tpu.wait_dma2 semaphore(%arg2 : memref<!tpu.dma_semaphore, #tpu.memory_space<semaphore_mem>>) src(%arg0 : memref<2x4x16x1xf32, #tpu.memory_space<any>>) dst(%arg1 : memref<2x4x16x1xf32, #tpu.memory_space<any>>)
    return
  }
}

</mosaic_0001>

<bundles_post_ra>
// kernel: tpu_custom_call.1
= control target key start
LH: loop header
LB: loop body
LE: loop exit
PB: predicated region body
PF: predicated region fallthrough
CT: control target
= control target key end

     0   :  { %s206_s0 = inlined_call_operand.vmem [shape: f32[2,4,16,1], index: 0, kind: input, shape index: {}]   ;;  %s207_s1 = inlined_call_operand.vmem [shape: f32[2,4,16,1], index: 1, kind: output, shape index: {}]  }
   0x1   :  { %v38_v0 = vld [vmem:[%s206_s0] sm:$0xff]  ;;  %v40_v1 = vld [vmem:[%s206_s0 + $0x8] sm:$0xff]  ;;  %v42_v2 = vld [vmem:[%s206_s0 + $0x10] sm:$0xff] }
   0x2   :  { %39 = vst [vmem:[%s207_s1] sm:$0xff] %v38_v0  ;;  %41 = vst [vmem:[%s207_s1 + $0x8] sm:$0xff] %v40_v1  ;;  %v44_v3 = vld [vmem:[%s206_s0 + $0x18] sm:$0xff]  ;;  %v46_v4 = vld [vmem:[%s206_s0 + $0x20] sm:$0xff] }
   0x3   :  { %43 = vst [vmem:[%s207_s1 + $0x10] sm:$0xff] %v42_v2  ;;  %v48_v5 = vld [vmem:[%s206_s0 + $0x28] sm:$0xff]  ;;  %45 = vst [vmem:[%s207_s1 + $0x18] sm:$0xff] %v44_v3  ;;  %v50_v6 = vld [vmem:[%s206_s0 + $0x30] sm:$0xff] }
   0x4   :  { %47 = vst [vmem:[%s207_s1 + $0x20] sm:$0xff] %v46_v4  ;;  %49 = vst [vmem:[%s207_s1 + $0x28] sm:$0xff] %v48_v5  ;;  %v52_v7 = vld [vmem:[%s206_s0 + $0x38] sm:$0xff]  ;;  %v54_v8 = vld [vmem:[%s206_s0 + $0x40] sm:$0xff] }
   0x5   :  { %51 = vst [vmem:[%s207_s1 + $0x30] sm:$0xff] %v50_v6  ;;  %53 = vst [vmem:[%s207_s1 + $0x38] sm:$0xff] %v52_v7  ;;  %v56_v9 = vld [vmem:[%s206_s0 + $0x48] sm:$0xff]  ;;  %v58_v10 = vld [vmem:[%s206_s0 + $0x50] sm:$0xff] }
   0x6   :  { %55 = vst [vmem:[%s207_s1 + $0x40] sm:$0xff] %v54_v8  ;;  %v60_v11 = vld [vmem:[%s206_s0 + $0x58] sm:$0xff]  ;;  %57 = vst [vmem:[%s207_s1 + $0x48] sm:$0xff] %v56_v9  ;;  %v62_v12 = vld [vmem:[%s206_s0 + $0x60] sm:$0xff] }
   0x7   :  { %59 = vst [vmem:[%s207_s1 + $0x50] sm:$0xff] %v58_v10  ;;  %61 = vst [vmem:[%s207_s1 + $0x58] sm:$0xff] %v60_v11  ;;  %v64_v13 = vld [vmem:[%s206_s0 + $0x68] sm:$0xff]  ;;  %v66_v14 = vld [vmem:[%s206_s0 + $0x70] sm:$0xff] }
   0x8   :  { %63 = vst [vmem:[%s207_s1 + $0x60] sm:$0xff] %v62_v12  ;;  %65 = vst [vmem:[%s207_s1 + $0x68] sm:$0xff] %v64_v13  ;;  %v68_v15 = vld [vmem:[%s206_s0 + $0x78] sm:$0xff] }
   0x9   :  { %67 = vst [vmem:[%s207_s1 + $0x70] sm:$0xff] %v66_v14  ;;  %69 = vst [vmem:[%s207_s1 + $0x78] sm:$0xff] %v68_v15 }
   0xa   :  { %77 = vsyncadd [#allocation2], 2048 }
   0xb   :  { %98 = dma.done.wait [#allocation2], 2048 }
   0xc   :  { %99 = vsyncadd [#allocation2], 4294965248 }
   0xd   :  { %83 = vsyncmov [#allocation2] }
  0x10   :  { %s84_s12 = vpop.sfrf %83 }
  0x11   :  { %p97_p0 = scmp.ne.s32.totalorder %s84_s12, 0 }
  0x13   :  { %88 = shalt.err (%p97_p0)  }

</bundles_post_ra>
